<compile_context>
chip_gen: v7x
topology: tpu7x:2x2x1
jax: 0.10.0
libtpu: 0.0.40
codegen_flags: <defaults>
</compile_context>

<pallas_src>
import math
from functools import partial

import jax
import jax.numpy as jnp
import numpy as np
from jax import lax
from jax.experimental import pallas as pl
from jax.experimental.pallas import tpu as pltpu


def _mha_kernel(x_ref, wqkv_ref, bqkv_ref, wo_ref, bo_ref,
                o_ref, acc_ref, *, head_dim: int):
    h = pl.program_id(1)

    @pl.when(h == 0)
    def _():
        acc_ref[...] = jnp.zeros_like(acc_ref)

    x = x_ref[0]            # (T, D)      bf16
    wqkv = wqkv_ref[0]      # (D, 3*dh)   bf16   (q-part pre-scaled by 1/sqrt(dh))
    bqkv = bqkv_ref[0]      # (1, 3*dh)   f32    (k-part is zero)
    wo = wo_ref[0]          # (dh, D)     bf16

    # Fused per-head q/k/v projection: one MXU pass, f32 accumulation.
    qkv = jnp.dot(x, wqkv, preferred_element_type=jnp.float32) + bqkv   # (T, 3*dh)

    dh = head_dim
    q = qkv[:, 0:dh].astype(jnp.bfloat16)          # already scaled
    k = qkv[:, dh:2 * dh].astype(jnp.bfloat16)
    v = qkv[:, 2 * dh:3 * dh].astype(jnp.bfloat16)

    # Scores: q @ k^T via dot_general contracting last dims (no K relayout).
    s = lax.dot_general(q, k,
                        dimension_numbers=(((1,), (1,)), ((), ())),
                        preferred_element_type=jnp.float32)             # (T, T)
    s = s - jnp.max(s, axis=-1, keepdims=True)
    p = jnp.exp(s)
    p = p * pl.reciprocal(jnp.sum(p, axis=-1, keepdims=True), approx=True)

    o_h = jnp.dot(p.astype(jnp.bfloat16), v,
                  preferred_element_type=jnp.float32)                   # (T, dh)

    # Fold this head's output-projection contribution into the accumulator.
    acc_ref[...] += jnp.dot(o_h.astype(jnp.bfloat16), wo,
                            preferred_element_type=jnp.float32)         # (T, D)

    @pl.when(h == pl.num_programs(1) - 1)
    def _():
        o_ref[0] = (acc_ref[...] + bo_ref[...]).astype(o_ref.dtype)


def multi_head_attention(x, params, n_head: int):
    """x: (B, T, D).  params: PyTorch-convention (out, in) weights / (D,) biases."""
    B, T, D = x.shape
    assert D % n_head == 0
    dh = D // n_head
    scale = 1.0 / math.sqrt(dh)

    bf16, f32 = jnp.bfloat16, jnp.float32

    # (out,in) -> (in,out), split per head: (H, D, dh).
    def per_head_in(w):
        return jnp.asarray(w, f32).T.reshape(D, n_head, dh).transpose(1, 0, 2)

    wq = per_head_in(params["wq"]) * scale          # fold SDPA scale into q projection
    wk = per_head_in(params["wk"])
    wv = per_head_in(params["wv"])
    wqkv = jnp.concatenate([wq, wk, wv], axis=-1).astype(bf16)              # (H, D, 3*dh)

    bq = jnp.asarray(params["bq"], f32).reshape(n_head, 1, dh) * scale
    bk = jnp.zeros((n_head, 1, dh), f32)            # key projection has no bias
    bv = jnp.asarray(params["bv"], f32).reshape(n_head, 1, dh)
    bqkv = jnp.concatenate([bq, bk, bv], axis=-1).astype(f32)               # (H, 1, 3*dh)

    wo = jnp.asarray(params["wo"], f32).T.reshape(n_head, dh, D).astype(bf16)  # (H, dh, D)
    bo = jnp.asarray(params["bo"], f32).reshape(1, D)                          # (1, D)

    x_bf = x.astype(bf16)

    kernel = partial(_mha_kernel, head_dim=dh)

    xspec = pl.BlockSpec((1, T, D), lambda b, h: (b, 0, 0))
    wqkv_spec = pl.BlockSpec((1, D, 3 * dh), lambda b, h: (h, 0, 0))
    bqkv_spec = pl.BlockSpec((1, 1, 3 * dh), lambda b, h: (h, 0, 0))
    wo_spec = pl.BlockSpec((1, dh, D), lambda b, h: (h, 0, 0))
    bo_spec = pl.BlockSpec((1, D), lambda b, h: (0, 0))

    out = pl.pallas_call(
        kernel,
        out_shape=jax.ShapeDtypeStruct((B, T, D), x.dtype),
        grid_spec=pltpu.PrefetchScalarGridSpec(
            num_scalar_prefetch=0,
            grid=(B, n_head),
            in_specs=[xspec, wqkv_spec, bqkv_spec, wo_spec, bo_spec],
            out_specs=xspec,
            scratch_shapes=[pltpu.VMEM((T, D), jnp.float32)],
        ),
        compiler_params=pltpu.CompilerParams(
            dimension_semantics=("parallel", "arbitrary")),
    )(x_bf, wqkv, bqkv, wo, bo)

    # Matches module's return: (self.out(wv), qk) with qk=None on the SDPA path.
    return out, None


def _reference(x, params, n_head):
    """Pure-JAX f32 reference mirroring the PyTorch forward (SDPA path)."""
    B, T, D = x.shape
    dh = D // n_head
    q = x @ params["wq"].T + params["bq"]
    k = x @ params["wk"].T
    v = x @ params["wv"].T + params["bv"]

    def split(t):  # (B,T,D) -> (B,H,T,dh)
        return t.reshape(B, T, n_head, dh).transpose(0, 2, 1, 3)

    q, k, v = split(q), split(k), split(v)
    s = jnp.einsum("bhqd,bhkd->bhqk", q, k) / math.sqrt(dh)
    p = jax.nn.softmax(s, axis=-1)
    a = jnp.einsum("bhqk,bhkd->bhqd", p, v)
    a = a.transpose(0, 2, 1, 3).reshape(B, T, D)
    return a @ params["wo"].T + params["bo"]


if __name__ == "__main__":
    B, T, D, H = 2, 8, 32, 4   # batch, n_ctx, n_state, n_head

    key = jax.random.PRNGKey(0)
    ks = jax.random.split(key, 8)
    sc = 1.0 / math.sqrt(D)
    params = {
        "wq": jax.random.normal(ks[0], (D, D), jnp.float32) * sc,
        "bq": jax.random.normal(ks[1], (D,), jnp.float32) * 0.1,
        "wk": jax.random.normal(ks[2], (D, D), jnp.float32) * sc,
        "wv": jax.random.normal(ks[3], (D, D), jnp.float32) * sc,
        "bv": jax.random.normal(ks[4], (D,), jnp.float32) * 0.1,
        "wo": jax.random.normal(ks[5], (D, D), jnp.float32) * sc,
        "bo": jax.random.normal(ks[6], (D,), jnp.float32) * 0.1,
    }
    x = jax.random.normal(ks[7], (B, T, D), jnp.float32)

    out, qk = multi_head_attention(x, params, n_head=H)
    out = jax.block_until_ready(out)

    ref = _reference(x, params, H)
    # bf16 matmul operands + approx reciprocal -> loosened tolerance vs f32 ref.
    np.testing.assert_allclose(np.asarray(out, dtype=np.float32),
                               np.asarray(ref), rtol=5e-2, atol=5e-2)
    assert qk is None  # use_sdpa=True path returns qk=None

    print("KERNEL_OK")
</pallas_src>

<mosaic_0001>
module attributes {stable_mosaic.version = 11 : i64} {
  func.func @_mha_kernel(%arg0: i32, %arg1: i32, %arg2: memref<1x8x32xbf16, #tpu.memory_space<vmem>>, %arg3: memref<1x32x24xbf16, #tpu.memory_space<vmem>>, %arg4: memref<1x1x24xf32, #tpu.memory_space<vmem>>, %arg5: memref<1x8x32xbf16, #tpu.memory_space<vmem>>, %arg6: memref<1x32xf32, #tpu.memory_space<vmem>>, %arg7: memref<1x8x32xf32, #tpu.memory_space<vmem>>, %arg8: memref<8x32xf32, #tpu.memory_space<vmem>>) attributes {dimension_semantics = [#tpu.dimension_semantics<parallel>, #tpu.dimension_semantics<arbitrary>], iteration_bounds = array<i64: 2, 4>, scalar_prefetch = 0 : i64, scratch_operands = 1 : i64, tpu.core_type = #tpu.core_type<tc>, window_params = [{transform_indices = @transform_0, window_bounds = array<i64: 1, 8, 32>}, {transform_indices = @transform_1, window_bounds = array<i64: 1, 32, 24>}, {transform_indices = @transform_2, window_bounds = array<i64: 1, 1, 24>}, {transform_indices = @transform_3, window_bounds = array<i64: 1, 8, 32>}, {pipeline_mode = #tpu.pipeline_mode<synchronous>, transform_indices = @transform_4, window_bounds = array<i64: 1, 32>}, {transform_indices = @transform_5, window_bounds = array<i64: 1, 8, 32>}]} {
    %c0_i32 = arith.constant 0 : i32
    %0 = arith.cmpi eq, %arg1, %c0_i32 : i32
    %1 = arith.extui %0 : i1 to i32
    %c0_i32_0 = arith.constant 0 : i32
    %2 = arith.cmpi ne, %1, %c0_i32_0 : i32
    scf.if %2 {
      %cst_22 = arith.constant 0.000000e+00 : f32
      %41 = vector.broadcast %cst_22 : f32 to vector<8x32xf32>
      %c0_23 = arith.constant 0 : index
      %c0_24 = arith.constant 0 : index
      %42 = vector.load %arg8[%c0_23, %c0_24] : memref<8x32xf32, #tpu.memory_space<vmem>>, vector<8x32xf32>
      tpu.vector_store %arg8[%c0_23, %c0_24], %41 {strides = array<i32>} : memref<8x32xf32, #tpu.memory_space<vmem>>, vector<8x32xf32>,
    } else {
    }
    %c0 = arith.constant 0 : index
    %c0_1 = arith.constant 0 : index
    %c0_2 = arith.constant 0 : index
    %3 = vector.load %arg2[%c0, %c0_1, %c0_2] : memref<1x8x32xbf16, #tpu.memory_space<vmem>>, vector<1x8x32xbf16>
    %4 = vector.shape_cast %3 : vector<1x8x32xbf16> to vector<8x32xbf16>
    %c0_3 = arith.constant 0 : index
    %c0_4 = arith.constant 0 : index
    %c0_5 = arith.constant 0 : index
    %5 = vector.load %arg3[%c0_3, %c0_4, %c0_5] : memref<1x32x24xbf16, #tpu.memory_space<vmem>>, vector<1x32x24xbf16>
    %6 = vector.shape_cast %5 : vector<1x32x24xbf16> to vector<32x24xbf16>
    %c0_6 = arith.constant 0 : index
    %c0_7 = arith.constant 0 : index
    %c0_8 = arith.constant 0 : index
    %7 = vector.load %arg4[%c0_6, %c0_7, %c0_8] : memref<1x1x24xf32, #tpu.memory_space<vmem>>, vector<1x1x24xf32>
    %8 = vector.shape_cast %7 : vector<1x1x24xf32> to vector<1x24xf32>
    %c0_9 = arith.constant 0 : index
    %c0_10 = arith.constant 0 : index
    %c0_11 = arith.constant 0 : index
    %9 = vector.load %arg5[%c0_9, %c0_10, %c0_11] : memref<1x8x32xbf16, #tpu.memory_space<vmem>>, vector<1x8x32xbf16>
    %10 = vector.shape_cast %9 : vector<1x8x32xbf16> to vector<8x32xbf16>
    %cst = arith.constant dense<0.000000e+00> : vector<8x24xf32>
    %11 = tpu.matmul %4, %6, %cst {dimension_numbers = #tpu.dot_dimension_numbers<[1], [0], [0], [1], [0, 0, 1, 1], [], []>} : vector<8x32xbf16>, vector<32x24xbf16>, vector<8x24xf32> -> vector<8x24xf32>
    %12 = vector.broadcast %8 : vector<1x24xf32> to vector<8x24xf32>
    %13 = arith.addf %11, %12 : vector<8x24xf32>
    %14 = vector.extract_strided_slice %13 {offsets = [0, 0], sizes = [8, 8], strides = [1, 1]} : vector<8x24xf32> to vector<8x8xf32>
    %15 = arith.truncf %14 : vector<8x8xf32> to vector<8x8xbf16>
    %16 = vector.extract_strided_slice %13 {offsets = [0, 8], sizes = [8, 8], strides = [1, 1]} : vector<8x24xf32> to vector<8x8xf32>
    %17 = arith.truncf %16 : vector<8x8xf32> to vector<8x8xbf16>
    %18 = vector.extract_strided_slice %13 {offsets = [0, 16], sizes = [8, 8], strides = [1, 1]} : vector<8x24xf32> to vector<8x8xf32>
    %19 = arith.truncf %18 : vector<8x8xf32> to vector<8x8xbf16>
    %cst_12 = arith.constant dense<0.000000e+00> : vector<8x8xf32>
    %20 = tpu.matmul %15, %17, %cst_12 {dimension_numbers = #tpu.dot_dimension_numbers<[1], [1], [0], [0], [0, 0, 1, 0], [], []>} : vector<8x8xbf16>, vector<8x8xbf16>, vector<8x8xf32> -> vector<8x8xf32>
    %cst_13 = arith.constant dense<0xFF800000> : vector<8xf32>
    %21 = vector.multi_reduction <maximumf>, %20, %cst_13 [1] : vector<8x8xf32> to vector<8xf32>
    %22 = vector.shape_cast %21 : vector<8xf32> to vector<8x1xf32>
    %23 = vector.broadcast %22 : vector<8x1xf32> to vector<8x8xf32>
    %24 = arith.subf %20, %23 : vector<8x8xf32>
    %25 = math.exp %24 : vector<8x8xf32>
    %cst_14 = arith.constant dense<0.000000e+00> : vector<8xf32>
    %26 = vector.multi_reduction <add>, %25, %cst_14 [1] : vector<8x8xf32> to vector<8xf32>
    %27 = vector.shape_cast %26 : vector<8xf32> to vector<8x1xf32>
    %28 = tpu.reciprocal %27 {approx = true} : vector<8x1xf32> -> vector<8x1xf32>
    %29 = vector.broadcast %28 : vector<8x1xf32> to vector<8x8xf32>
    %30 = arith.mulf %25, %29 : vector<8x8xf32>
    %31 = arith.truncf %30 : vector<8x8xf32> to vector<8x8xbf16>
    %cst_15 = arith.constant dense<0.000000e+00> : vector<8x8xf32>
    %32 = tpu.matmul %31, %19, %cst_15 {dimension_numbers = #tpu.dot_dimension_numbers<[1], [0], [0], [1], [0, 0, 1, 1], [], []>} : vector<8x8xbf16>, vector<8x8xbf16>, vector<8x8xf32> -> vector<8x8xf32>
    %c0_16 = arith.constant 0 : index
    %c0_17 = arith.constant 0 : index
    %33 = vector.load %arg8[%c0_16, %c0_17] : memref<8x32xf32, #tpu.memory_space<vmem>>, vector<8x32xf32>
    %34 = arith.truncf %32 : vector<8x8xf32> to vector<8x8xbf16>
    %cst_18 = arith.constant dense<0.000000e+00> : vector<8x32xf32>
    %35 = tpu.matmul %34, %10, %cst_18 {dimension_numbers = #tpu.dot_dimension_numbers<[1], [0], [0], [1], [0, 0, 1, 1], [], []>} : vector<8x8xbf16>, vector<8x32xbf16>, vector<8x32xf32> -> vector<8x32xf32>
    %36 = arith.addf %33, %35 : vector<8x32xf32>
    %c0_19 = arith.constant 0 : index
    %c0_20 = arith.constant 0 : index
    %37 = vector.load %arg8[%c0_19, %c0_20] : memref<8x32xf32, #tpu.memory_space<vmem>>, vector<8x32xf32>
    tpu.vector_store %arg8[%c0_19, %c0_20], %36 {strides = array<i32>} : memref<8x32xf32, #tpu.memory_space<vmem>>, vector<8x32xf32>,
    %c3_i32 = arith.constant 3 : i32
    %38 = arith.cmpi eq, %arg1, %c3_i32 : i32
    %39 = arith.extui %38 : i1 to i32
    %c0_i32_21 = arith.constant 0 : i32
    %40 = arith.cmpi ne, %39, %c0_i32_21 : i32
    scf.if %40 {
      %c0_22 = arith.constant 0 : index
      %c0_23 = arith.constant 0 : index
      %41 = vector.load %arg8[%c0_22, %c0_23] : memref<8x32xf32, #tpu.memory_space<vmem>>, vector<8x32xf32>
      %c0_24 = arith.constant 0 : index
      %c0_25 = arith.constant 0 : index
      %42 = vector.load %arg6[%c0_24, %c0_25] : memref<1x32xf32, #tpu.memory_space<vmem>>, vector<1x32xf32>
      %43 = vector.broadcast %42 : vector<1x32xf32> to vector<8x32xf32>
      %44 = arith.addf %41, %43 : vector<8x32xf32>
      %c0_26 = arith.constant 0 : index
      %c0_27 = arith.constant 0 : index
      %c0_28 = arith.constant 0 : index
      %45 = vector.load %arg7[%c0_26, %c0_27, %c0_28] : memref<1x8x32xf32, #tpu.memory_space<vmem>>, vector<1x8x32xf32>
      %46 = vector.shape_cast %45 : vector<1x8x32xf32> to vector<8x32xf32>
      %47 = vector.shape_cast %44 : vector<8x32xf32> to vector<1x8x32xf32>
      tpu.vector_store %arg7[%c0_26, %c0_27, %c0_28], %47 {strides = array<i32>} : memref<1x8x32xf32, #tpu.memory_space<vmem>>, vector<1x8x32xf32>,
    } else {
    }
    return
  }
  func.func @transform_0(%arg0: i32, %arg1: i32) -> (i32, i32, i32) {
    %c0_i32 = arith.constant 0 : i32
    %c0_i32_0 = arith.constant 0 : i32
    %c0_i32_1 = arith.constant 0 : i32
    return %arg0, %c0_i32, %c0_i32_0 : i32, i32, i32
  }
  func.func @transform_1(%arg0: i32, %arg1: i32) -> (i32, i32, i32) {
    %c0_i32 = arith.constant 0 : i32
    %c0_i32_0 = arith.constant 0 : i32
    %c0_i32_1 = arith.constant 0 : i32
    return %arg1, %c0_i32, %c0_i32_0 : i32, i32, i32
  }
  func.func @transform_2(%arg0: i32, %arg1: i32) -> (i32, i32, i32) {
    %c0_i32 = arith.constant 0 : i32
    %c0_i32_0 = arith.constant 0 : i32
    %c0_i32_1 = arith.constant 0 : i32
    return %arg1, %c0_i32, %c0_i32_0 : i32, i32, i32
  }
  func.func @transform_3(%arg0: i32, %arg1: i32) -> (i32, i32, i32) {
    %c0_i32 = arith.constant 0 : i32
    %c0_i32_0 = arith.constant 0 : i32
    %c0_i32_1 = arith.constant 0 : i32
    return %arg1, %c0_i32, %c0_i32_0 : i32, i32, i32
  }
  func.func @transform_4(%arg0: i32, %arg1: i32) -> (i32, i32) {
    %c0_i32 = arith.constant 0 : i32
    %c0_i32_0 = arith.constant 0 : i32
    %c0_i32_1 = arith.constant 0 : i32
    return %c0_i32, %c0_i32_0 : i32, i32
  }
  func.func @transform_5(%arg0: i32, %arg1: i32) -> (i32, i32, i32) {
    %c0_i32 = arith.constant 0 : i32
    %c0_i32_0 = arith.constant 0 : i32
    %c0_i32_1 = arith.constant 0 : i32
    return %arg0, %c0_i32, %c0_i32_0 : i32, i32, i32
  }
}

</mosaic_0001>

<bundles_post_ra>
// kernel: tpu_custom_call.1
= control target key start
LH: loop header
LB: loop body
LE: loop exit
PB: predicated region body
PF: predicated region fallthrough
CT: control target
= control target key end

     0   :  { %10 = vsyncpa [#allocation4], 0  ;;  %s1100_s0 = inlined_call_operand.vmem [shape: bf16[2,8,32], index: 0, kind: input, shape index: {}]   ;;  %s1101_s1 = inlined_call_operand.vmem [shape: bf16[4,32,24], index: 1, kind: input, shape index: {}]   ;;  %s1102_s2 = inlined_call_operand.vmem [shape: f32[4,1,24], index: 2, kind: input, shape index: {}]   ;;  %s1103_s3 = inlined_call_operand.vmem [shape: bf16[4,8,32], index: 3, kind: input, shape index: {}]   ;;  %s1104_s4 = inlined_call_operand.vmem [shape: f32[1,32], index: 4, kind: input, shape index: {}]   ;;  %s1105_s5 = inlined_call_operand.hbm [shape: f32[2,8,32], index: 5, kind: output, shape index: {}]  }
   0x1   :  { %12 = vsyncpa [#allocation4 + $0x1], 0  ;;  %s926_s18 = smov 0   ;;  %s928_s19 = smov 0  }
   0x2   :  { %s930_s20 = smov 0   ;;  %s932_s21 = smov 0  }
   0x3   :  { %s934_s22 = smov 0   ;;  %s936_s23 = smov 0  }
   0x4   :  { %s938_s24 = smov 0   ;;  %s940_s25 = smov 0  }
   0x5 LB: > { %1111 = sst [smem:[#allocation6_spill]] %s868_s20  ;;  %s652_s26 = sadd.s32 4294967295, %s888_s25   ;;  %s888_s25 = sphi %s940_s25, %s18_s25   ;;  %s884_s24 = sphi %s938_s24, %s1125_s24   ;;  %s880_s23 = sphi %s936_s23, %s1124_s23   ;;  %s876_s22 = sphi %s934_s22, %s1123_s22   ;;  %s872_s21 = sphi %s932_s21, %s1122_s21   ;;  %s868_s20 = sphi %s930_s20, %s1121_s20   ;;  %s864_s19 = sphi %s928_s19, %s1127_s19   ;;  %s860_s18 = sphi %s926_s18, %s1126_s18  }
   0x6   : > { %1112 = sst [smem:[#allocation7_spill]] %s880_s23  ;;  %s653_s27 = sadd.s32 4294967294, %s888_s25  }
   0x7   : > { %1113 = sst [smem:[#allocation8_spill]] %s884_s24  ;;  %s27_s28 = sadd.s32 1, %s880_s23 }
   0x8   : > { %p28_p0 = scmp.ge.s32.totalorder %s27_s28, 4  ;;  %s30_s29 = sadd.s32 1, %s884_s24 }
   0x9   : > { %p172_p1 = scmp.ne.s32.totalorder %s868_s20, %s864_s19  ;;  %p173_p2 = scmp.eq.s32.totalorder %s652_s26, 7 }
   0xa   : > { %s1129_s28 = smov (%p28_p0, %s27_s28), 0  ;;  %s1131_s29 = smov (!%p28_p0, %s30_s29), %s884_s24 }
   0xb   : > { %1114 = sst [smem:[#allocation9_spill]] %s1129_s28  ;;  %p975_p3 = por %p173_p2, %p172_p1 }
   0xc   : > { %p178_p4 = scmp.ne.s32.totalorder %s864_s19, %s860_s18  ;;  %p32_p5 = scmp.ge.s32.totalorder %s1131_s29, 2 }
   0xd   : > { %p179_p6 = scmp.eq.s32.totalorder %s653_s27, 7  ;;  %p656_p7 = scmp.ge.s32.totalorder %s888_s25, 1 }
   0xe   : > { %p228_p8 = scmp.lt.s32.totalorder %s888_s25, 9  ;;  %s1133_s29 = smov (%p32_p5, %s1131_s29), 0 }
   0xf   : > { %1116 = sst [smem:[#allocation10_spill]] %s1133_s29  ;;  %p985_p9 = por %p179_p6, %p178_p4 }
  0x10   : > { %p229_p10 = pnand %p656_p7, %p228_p8  ;;  %s159_s7 = ssub.s32 %s884_s24, %s1133_s29 }
  0x11   : > { %s162_s8 = sadd.s32 1, %s868_s20  ;;  %p160_p11 = scmp.eq.s32.totalorder %s159_s7, 0 }
  0x12   : > { %232 = sbr.rel (%p229_p10) target bundleno = 1377 (0x561), region = 40  ;;  %s1106_s10 = sand.u32 (!%p229_p10), 1, %s864_s19  }
  0x13   : > { %s993_s9 = scalar_select %p160_p11, %s868_s20, %s162_s8  }
  0x14   : > { %p267_p12 = scmp.lt.s32.totalorder (!%p229_p10), %s876_s22, 1  ;;  %s999_s11 = sshll.u32 (!%p229_p10), %s1106_s10, 3 }
  0x15   : > { %1118 = sst [smem:[#allocation11_spill]] %s993_s9  ;;  %p271_p13 = scmp.lt.s32.totalorder (!%p229_p10), %s872_s21, 3 }
  0x16   : > { %p662_p0 = scmp.ne.s32.totalorder (!%p229_p10), %s872_s21, 0 }
  0x19   : > { %s268_s12 = scalar_select %p267_p12, %s876_s22, 1 }
  0x1a   : > { %s1004_s13 = scalar_select %p271_p13, %s872_s21, 3 }
  0x1b   : > { %s658_s14 = sshll.u32 %s268_s12, 2  ;;  %s266_s12 = scalar_lea.vmem [#allocation3], %s999_s11  ;;  %vm288_vm0 = vcmask (!%p662_p0), 261120   ;;  %v890_v0 = vmov (!%p662_p0), 0.0  }
  0x1c   : > { %s270_s17 = scalar_lea.vmem %s1100_s0, %s658_s14  ;;  %s676_s26 = sshll.u32 %s1004_s13, 4  ;;  %289 = vst.msk [vmem:[#allocation2] sm:$0xff] (!%p662_p0), %vm288_vm0, %v890_v0 }
  0x1d   : > { %s275_s8 = scalar_lea.vmem %s1101_s1, %s676_s26  ;;  %s278_s28 = scalar_lea.vmem %s1102_s2, %s1004_s13 }
  0x1e   : > { %s661_s24 = sshll.u32 %s1004_s13, 2  ;;  %287 = sbr.rel (%p662_p0) target bundleno = 37 (0x25), region = 44 }
  0x1f   : > { %s1021_s20 = scalar_lea.vmem %s1103_s3, %s661_s24 }
  0x25 PF: > { %v788_v1 = vld [vmem:[%s275_s8] sm:$0xff]   ;;  %v891_v2 = vmov 0.0   ;;  %v789_v3 = vld [vmem:[%s275_s8 + $0x8] sm:$0xff]   ;;  %vm892_vm1 = vmmov 0   ;;  %vm315_vm2 = vcmask 261120   ;;  %s893_s23 = smov 120  }
  0x26   : > { %686 = vmatprep.subr.bf16.mxu0 %v891_v2  ;;  %694 = vmatprep.subr.bf16.mxu1 %v891_v2  ;;  %v290_v4 = vld [vmem:[%s270_s17] sm:$0xf]  ;;  %vm363_vm3 = vcmask 64512   ;;  %s894_s24 = smov 112   ;;  %vm427_vm4 = vcmask 1043456   ;;  %p670_p1 = scmp.ne.s32.totalorder %s872_s21, 3 }
  0x27   : > { %687 = vmatpush3.bf16.msra.mxu0 %v788_v1  ;;  %690 = vmatprep.mubr.msk.bf16.mxu0 %vm892_vm1, %v891_v2  ;;  %v663_v5 = vld [vmem:[%s278_s28] ss:$0 sm:$0xff] }
  0x28   : > { %688 = vmatprep.subr.bf16.mxu0 %v891_v2  ;;  %696 = vmatprep.mubr.msk.bf16.mxu1 %vm892_vm1, %v891_v2  ;;  %v296_v24 = vld [vmem:[%s1021_s20] sm:$0xf] }
  0x29   : > { %v477_v25 = vsel %vm427_vm4, %v296_v24, 0  ;;  %v471_v37 = vld [vmem:[#allocation2] sm:$0xff] }
  0x2a   : > { %v671_v44 = vld [vmem:[%s1104_s4] ss:$0 sm:$0xff] (!%p670_p1) }
  0x2b   : > { %689 = vmatpush3.bf16.msra.mxu0 %v789_v3 }
  0x2c   : > { %700 = vmatprep.subr.bf16.mxu0 %v891_v2 }
  0x2e   : > { %691 = vmatmul.mubr.msk.bf16.vlgmr.msra.gmra.mrb[0].mxu0 %vm315_vm2, %v290_v4 }
  0x2f   : > { %702 = vmatprep.mubr.msk.bf16.mxu0 %vm892_vm1, %v891_v2 }
 0x101   : > { %v353_v6 = vpop.f32.mrb[0].mxu0 }
 0x102   : > { %v354_v7 = vadd.f32 %v663_v5, %v353_v6  ;;  %v692_v8 = vpop.f32.mrb[1].mxu0 }
 0x103   : > { %v356_v9 = vpop.f32.mrb[2].mxu0 }
 0x104   : > { %v359_v10 = vpack.c.bf16 %v354_v7, %v354_v7  ;;  %v693_v11 = vpop.f32.mrb[3].mxu0 }
 0x106   : > { %361 = vrot.lane.b32.xlu0 %v359_v10, %s893_s23 }
 0x178   : > { %v362_v12 = vpop.permute.xlu0 %361 }
 0x179   : > { %v368_v13 = vsel %vm363_vm3, %v362_v12, 0 }
 0x17a   : > { %695 = vmatpush3.bf16.xpose.msra.mxu1 %v368_v13 }
 0x17b   : > { %706 = vmatprep.subr.bf16.mxu1 %v891_v2 }
 0x181   : > { %697 = vmatmul.mubr.msk.bf16.vlgmr.msra.gmra.mrb[0].mxu1 %vm363_vm3, %v359_v10 }
 0x182   : > { %708 = vmatprep.mubr.msk.bf16.mxu1 %vm892_vm1, %v891_v2  ;;  %707 = vmatpush3.bf16.msra.mxu1 %v477_v25 }
 0x254   : > { %v404_v14 = vpop.f32.mrb[0].mxu1 }
 0x255   : > { %v698_v15 = vpop.f32.mrb[1].mxu1  ;;  %v410_v16 = vsel %vm363_vm3, %v404_v14, -inf }
 0x256   : > { %411 = vmax.xlane.f32.xlu0 %v410_v16  ;;  %v407_v17 = vpop.f32.mrb[2].mxu1 }
 0x257   : > { %v699_v18 = vpop.f32.mrb[3].mxu1 }
 0x2e3   : > { %v412_v19 = vpop.xlane.xlu0 %411 }
 0x2e4   : > { %v413_v20 = vsub.f32 %v404_v14, %v412_v19 }
 0x2e6   : > { %v414_v21 = vmul.f32 1.442695, %v413_v20 }
 0x2e8   : > { %790 = vpow2.f32 %v414_v21 }
 0x2f2   : > { %v791_v22 = vpop.eup %790 }
 0x2f3   : > { %v416_v23 = vsel %vm363_vm3, %v791_v22, 0.0 }
 0x2f4   : > { %417 = vadd.xlane.f32.xlu1 %v416_v23 }
 0x305   : > { %422 = vrot.lane.b32.xlu1 %v359_v10, %s894_s24 }
 0x381   : > { %v418_v26 = vpop.xlane.xlu1 %417 }
 0x382   : > { %792 = vrcp.f32 %v418_v26 }
 0x385   : > { %v423_v27 = vpop.permute.xlu1 %422 }
 0x386   : > { %v429_v28 = vsel %vm427_vm4, %v423_v27, 0 }
 0x387   : > { %701 = vmatpush3.bf16.msra.mxu0 %v429_v28 }
 0x38c   : > { %v793_v29 = vpop.eup %792 }
 0x38d   : > { %v420_v30 = vmul.f32 %v793_v29, %v791_v22 }
 0x38f   : > { %v421_v31 = vpack.c.bf16 %v420_v30, %v420_v30 }
 0x391   : > { %703 = vmatmul.mubr.msk.bf16.vlgmr.msra.gmra.mrb[4].mxu0 %vm363_vm3, %v421_v31 }
 0x464   : > { %v465_v32 = vpop.f32.mrb[4].mxu0 }
 0x465   : > { %v472_v33 = vpack.c.bf16 %v465_v32, %v465_v32  ;;  %v704_v34 = vpop.f32.mrb[5].mxu0 }
 0x466   : > { %v468_v35 = vpop.f32.mrb[6].mxu0 }
 0x467   : > { %v705_v36 = vpop.f32.mrb[7].mxu0  ;;  %709 = vmatmul.mubr.msk.bf16.vlgmr.msra.gmra.mrb[4].mxu1 %vm363_vm3, %v472_v33 }
 0x537   : > { %524 = sbr.rel (%p670_p1) target bundleno = 1352 (0x548), region = 48 }
 0x53a   : > { %v513_v38 = vpop.f32.mrb[4].mxu1 }
 0x53b   : > { %v519_v39 = vadd.f32 %v513_v38, %v471_v37  ;;  %v710_v40 = vpop.f32.mrb[5].mxu1 }
 0x53c   : > { %v516_v41 = vpop.f32.mrb[6].mxu1 }
 0x53d   : > { %520 = vst.msk [vmem:[#allocation2] sm:$0xff] %vm315_vm2, %v519_v39  ;;  %v711_v42 = vpop.f32.mrb[7].mxu1 }
 0x544   : > { %v525_v43 = vld [vmem:[#allocation2] sm:$0xff] }
 0x545   : > { %v533_v45 = vadd.f32 %v671_v44, %v525_v43 }
 0x547   : > { %534 = vst.msk [vmem:[%s266_s12] sm:$0xff] %vm315_vm2, %v533_v45 }
 0x548 PF: > { %s673_s29 = sshll.u32 %s876_s22, 7  ;;  %s549_s13 = sshll.u32 %s266_s12, 4  ;;  %s550_s13 = int_to_ptr.vmem [resolvable:$true] %s549_s13 }
 0x549   : > { %s1049_s21 = scalar_lea.hbm %s1105_s5, %s673_s29  ;;  %s1119_s14 = sand.u32 1, %s864_s19  }
 0x54a   : > { %s536_s15 = scalar_lea.sflag [#allocation4], %s1119_s14  ;;  %s794_s16 = scalar_lea.vmem %s550_s13, 128 }
 0x54b   : > { %p795_p2 = scmp.ne.s32.totalorder %s550_s13, %s794_s16  ;;  %s895_s17 = smov [#allocation3]  }
 0x54c   : > { %s798_s26 = sshll.u32 %s895_s17, 4  ;;  %s799_s26 = int_to_ptr.vmem [resolvable:$false] %s798_s26 }
 0x54d   : > { %p796_p4 = pnand %p795_p2, %p975_p3  ;;  %s800_s27 = scalar_lea.vmem %s799_s26, 256 }
 0x54e   : > { %p801_p6 = scmp.lt.s32.totalorder %s550_s13, %s799_s26  ;;  %p802_p7 = scmp.lt.s32.totalorder %s800_s27, %s794_s16 }
 0x54f   : > { %p797_p5 = pneg %p796_p4 }
 0x550   : > { %p803_p8 = por %p802_p7, %p801_p6 }
 0x552   : > { %p804_p10 = pnand %p803_p8, %p797_p5 }
 0x554   : > { %807 = shalt.err (!%p804_p10)
}
 0x555   : > { %s808_s22 = scalar_lea.hbm %s1049_s21, 128  ;;  %s812_s8 = scalar_lea.hbm %s1105_s5, 256 }
 0x556   : > { %p809_p11 = scmp.ne.s32.totalorder %s1049_s21, %s808_s22  ;;  %p813_p0 = scmp.lt.u32.totalorder %s1049_s21, %s1105_s5 }
 0x557   : > { %p814_p1 = scmp.lt.u32.totalorder %s812_s8, %s808_s22  ;;  %p816_p4 = scmp.lt.u32.totalorder %s808_s22, %s1049_s21 }
 0x558   : > { %p810_p12 = pnand %p809_p11, %p975_p3 }
 0x559   : > { %p815_p2 = por %p814_p1, %p813_p0 }
 0x55a   : > { %p811_p13 = pneg %p810_p12 }
 0x55b   : > { %p817_p5 = por %p816_p4, %p815_p2 }
 0x55d   : > { %p818_p6 = pnand %p817_p5, %p811_p13 }
 0x55f   : > { %821 = shalt.err (!%p818_p6)
}
 0x560   : > { %712 = dma.vmem_to_hbm [thread:$0]  (%p975_p3), %s550_s13, 128, %s1049_s21, %s536_s15  }
 0x561 PF: > { %p718_p7 = scmp.ge.s32.totalorder %s888_s25, 2  ;;  %s561_s24 = sand.u32 1, %s860_s18  }
 0x562   : > { %s562_s20 = scalar_lea.sflag [#allocation4], %s561_s24 }
 0x563   : > { %p715_p8 = pnand %p718_p7, %p985_p9 }
 0x565   : > { %855 = dma.done.wait (!%p715_p8), %s562_s20, 128  }
 0x566   : > { %857 = vsyncadd (!%p715_p8), %s562_s20, 4294967168  ;;  %s18_s25 = sadd.s32 1, %s888_s25   ;;  %s1120_s28 = sld [smem:[#allocation6_spill]] }
 0x567   : > { %p15_p10 = scmp.ge.s32.totalorder %s18_s25, 10   ;;  %s1121_s20 = sld [smem:[#allocation11_spill]] }
 0x568   : > { %s1122_s21 = sld [smem:[#allocation7_spill]]  ;;  %s1123_s22 = sld [smem:[#allocation8_spill]] }
 0x569   : > { %s1124_s23 = sld [smem:[#allocation9_spill]]  ;;  %s1125_s24 = sld [smem:[#allocation10_spill]] }
 0x56a   : > { %s1126_s18 = smov %s864_s19  ;;  %17 = sbr.rel (!%p15_p10) target bundleno = 5 (0x5), region = 92 }
 0x56c   : > { %s1127_s19 = smov %s1120_s28 }
 0x571   :  { %567 = vsyncpa [#allocation4], 1 }
 0x572   :  { %569 = vsyncpa [#allocation4 + $0x1], 1 }

</bundles_post_ra>
